<compile_context>
chip_gen: v7x
topology: tpu7x:2x2x1
jax: 0.10.0
libtpu: 0.0.40
codegen_flags: <defaults>
</compile_context>

<pallas_src>
import functools

import jax
import jax.numpy as jnp
from jax.experimental import pallas as pl
from jax.experimental.pallas import tpu as pltpu


def _naive_kernel(seed_ref, out_ref, *, threshold, lane_tile):
    """seed_ref: (1,) int32 in SMEM.  out_ref: (8, lane_tile) float32 block."""
    # Global output-row index for every lane of this block (same across the 8
    # sublanes — each lane is one output row).
    lane = jax.lax.broadcasted_iota(jnp.int32, out_ref.shape, 1)
    idx = (lane + pl.program_id(0) * lane_tile).astype(jnp.uint32)

    # Counter-based hash PRNG (stateless, per-lane independent, VPU-only).
    seed_u = seed_ref[0].astype(jnp.uint32)
    h = idx * jnp.uint32(0x9E3779B1) + seed_u * jnp.uint32(0x85EBCA77)
    h = h ^ (h >> jnp.uint32(16))
    h = h * jnp.uint32(0x7FEB352D)
    h = h ^ (h >> jnp.uint32(15))
    h = h * jnp.uint32(0x846CA68B)
    h = h ^ (h >> jnp.uint32(16))

    # Integer-threshold Bernoulli(cut_probability): P(h < threshold) = p.
    cut = (h < jnp.uint32(threshold)).astype(jnp.float32)  # (8, lane_tile)

    # Sublane row 1 = cut, every other row = 1 - cut (only rows 0/1 are kept).
    sub = jax.lax.broadcasted_iota(jnp.int32, out_ref.shape, 0)
    out_ref[...] = jnp.where(sub == 1, cut, 1.0 - cut)


def naive_forward(x, seed, segment_average_size):
    """Pallas equivalent of Naive(segment_average_size).forward(x).

    x:    [B, S, D] array (values unused, shape only).
    seed: int32 scalar seeding the synthetic in-kernel RNG.
    Returns: (B*(S-1), 2) float32; column 1 is the Bernoulli cut, column 0 its
             complement.
    """
    B, S = int(x.shape[0]), int(x.shape[1])
    n = B * (S - 1)
    if n <= 0:
        return jnp.zeros((0, 2), dtype=jnp.float32)

    cut_probability = 1.0 / float(segment_average_size)
    threshold = min(int(round(cut_probability * 2.0 ** 32)), 2 ** 32 - 1)

    # Lane-pad N up to a multiple of the tile width (>= 128).
    n_128 = max(128, ((n + 127) // 128) * 128)
    lane_tile = min(2048, n_128)
    n_pad = ((n_128 + lane_tile - 1) // lane_tile) * lane_tile
    grid = (n_pad // lane_tile,)

    out_padded = pl.pallas_call(
        functools.partial(_naive_kernel, threshold=threshold, lane_tile=lane_tile),
        out_shape=jax.ShapeDtypeStruct((8, n_pad), jnp.float32),
        grid=grid,
        in_specs=[pl.BlockSpec(memory_space=pltpu.MemorySpace.SMEM)],
        out_specs=pl.BlockSpec((8, lane_tile), lambda i: (0, i)),
        compiler_params=pltpu.CompilerParams(
            dimension_semantics=("parallel",),
            vmem_limit_bytes=32 * 1024 * 1024,
        ),
    )(jnp.asarray([seed], dtype=jnp.int32))

    # Tiny glue slice: touches only 8*n bytes, then transposes to (n, 2).
    return out_padded[:2, :n].T


if __name__ == "__main__":
    # Small shapes consistent with the module: 2 documents, 8 sentences each,
    # 32-dim sentence embeddings (embedding values are never read).
    key = jax.random.PRNGKey(0)
    x = jax.random.normal(key, (2, 8, 32), dtype=jnp.float32)

    segment_average_size = 4
    out = naive_forward(x, seed=0, segment_average_size=segment_average_size)
    out = jax.block_until_ready(out)

    # Sanity checks mirroring the reference semantics.
    assert out.shape == (2 * (8 - 1), 2), out.shape
    assert out.dtype == jnp.float32
    # Each row is [1 - cut, cut] with cut in {0, 1}: rows sum to 1, entries in {0,1}.
    assert bool(jnp.all(jnp.abs(out.sum(axis=1) - 1.0) < 1e-6))
    assert bool(jnp.all((out == 0.0) | (out == 1.0)))

    print("KERNEL_OK")
</pallas_src>

<mosaic_0001>
module attributes {stable_mosaic.version = 11 : i64} {
  func.func @_naive_kernel(%arg0: i32, %arg1: memref<1xi32, #tpu.memory_space<smem>>, %arg2: memref<8x128xf32, #tpu.memory_space<vmem>>) attributes {dimension_semantics = [#tpu.dimension_semantics<parallel>], iteration_bounds = array<i64: 1>, scalar_prefetch = 0 : i64, scratch_operands = 0 : i64, tpu.core_type = #tpu.core_type<tc>, window_params = [{transform_indices = @transform_0, window_bounds = array<i64: 1>}, {transform_indices = @transform_1, window_bounds = array<i64: 8, 128>}]} {
    %0 = tpu.iota {dimensions = array<i32: 1>} : vector<8x128xi32>
    %c128_i32 = arith.constant 128 : i32
    %1 = arith.muli %arg0, %c128_i32 : i32
    %2 = vector.broadcast %1 : i32 to vector<8x128xi32>
    %3 = arith.addi %0, %2 : vector<8x128xi32>
    %c0 = arith.constant 0 : index
    %4 = memref.load %arg1[%c0] : memref<1xi32, #tpu.memory_space<smem>>
    %c-1640531535_i32 = arith.constant -1640531535 : i32
    %5 = vector.broadcast %c-1640531535_i32 : i32 to vector<8x128xi32>
    %6 = arith.muli %3, %5 : vector<8x128xi32>
    %c-2048144777_i32 = arith.constant -2048144777 : i32
    %7 = arith.muli %4, %c-2048144777_i32 : i32
    %8 = vector.broadcast %7 : i32 to vector<8x128xi32>
    %9 = arith.addi %6, %8 : vector<8x128xi32>
    %c16_i32 = arith.constant 16 : i32
    %10 = vector.broadcast %c16_i32 : i32 to vector<8x128xi32>
    %11 = arith.shrui %9, %10 : vector<8x128xi32>
    %12 = arith.xori %9, %11 : vector<8x128xi32>
    %c2146121005_i32 = arith.constant 2146121005 : i32
    %13 = vector.broadcast %c2146121005_i32 : i32 to vector<8x128xi32>
    %14 = arith.muli %12, %13 : vector<8x128xi32>
    %c15_i32 = arith.constant 15 : i32
    %15 = vector.broadcast %c15_i32 : i32 to vector<8x128xi32>
    %16 = arith.shrui %14, %15 : vector<8x128xi32>
    %17 = arith.xori %14, %16 : vector<8x128xi32>
    %c-2073254261_i32 = arith.constant -2073254261 : i32
    %18 = vector.broadcast %c-2073254261_i32 : i32 to vector<8x128xi32>
    %19 = arith.muli %17, %18 : vector<8x128xi32>
    %c16_i32_0 = arith.constant 16 : i32
    %20 = vector.broadcast %c16_i32_0 : i32 to vector<8x128xi32>
    %21 = arith.shrui %19, %20 : vector<8x128xi32>
    %22 = arith.xori %19, %21 : vector<8x128xi32>
    %c1073741824_i32 = arith.constant 1073741824 : i32
    %23 = vector.broadcast %c1073741824_i32 : i32 to vector<8x128xi32>
    %24 = arith.cmpi ult, %22, %23 : vector<8x128xi32>
    %25 = arith.extui %24 : vector<8x128xi1> to vector<8x128xi32>
    %26 = arith.sitofp %25 : vector<8x128xi32> to vector<8x128xf32>
    %27 = tpu.iota {dimensions = array<i32: 0>} : vector<8x128xi32>
    %c1_i32 = arith.constant 1 : i32
    %28 = vector.broadcast %c1_i32 : i32 to vector<8x128xi32>
    %29 = arith.cmpi eq, %27, %28 : vector<8x128xi32>
    %cst = arith.constant 1.000000e+00 : f32
    %30 = vector.broadcast %cst : f32 to vector<8x128xf32>
    %31 = arith.subf %30, %26 : vector<8x128xf32>
    %32 = arith.select %29, %26, %31 : vector<8x128xi1>, vector<8x128xf32>
    %c0_1 = arith.constant 0 : index
    %c0_2 = arith.constant 0 : index
    %33 = vector.load %arg2[%c0_1, %c0_2] : memref<8x128xf32, #tpu.memory_space<vmem>>, vector<8x128xf32>
    tpu.vector_store %arg2[%c0_1, %c0_2], %32 {strides = array<i32>} : memref<8x128xf32, #tpu.memory_space<vmem>>, vector<8x128xf32>,
    return
  }
  func.func @transform_0(%arg0: i32) -> i32 {
    %c0_i32 = arith.constant 0 : i32
    %c0_i32_0 = arith.constant 0 : i32
    return %c0_i32 : i32
  }
  func.func @transform_1(%arg0: i32) -> (i32, i32) {
    %c0_i32 = arith.constant 0 : i32
    %c0_i32_0 = arith.constant 0 : i32
    return %c0_i32, %arg0 : i32, i32
  }
}

</mosaic_0001>

<bundles_post_ra>
// kernel: tpu_custom_call.1
= control target key start
LH: loop header
LB: loop body
LE: loop exit
PB: predicated region body
PF: predicated region fallthrough
CT: control target
= control target key end

     0   :  { %v10_v0 = vlaneseq  ;;  %s105_s0 = inlined_call_operand.<no memory space> [shape: s32[1], index: 0, kind: input, shape index: {}]   ;;  %s106_s1 = inlined_call_operand.hbm [shape: f32[8,128], index: 1, kind: output, shape index: {}]  }
   0x1   :  { %s17_s8 = smul.u32 2246822519, %s105_s0 }
   0x2   :  { %7 = vsyncpa [#allocation4], 0  ;;  %v11_v1 = vand.u32 127, %v10_v0  ;;  %v32_v12 = vshrl.u32 %v10_v0, 7  ;;  %s78_s9 = smov [#allocation3]   ;;  %v79_v14 = vmov 0.0  }
   0x3   :  { %v18_v2 = vstv %s17_s8  ;;  %s43_s10 = sshll.u32 %s78_s9, 4  ;;  %s44_s10 = int_to_ptr.vmem [resolvable:$true] %s43_s10 }
   0x4   :  { %v16_v3 = vmul.u32 2654435761, %v11_v1  ;;  %vm33_vm1 = vcmp.eq.s32.totalorder %v32_v12, 1  ;;  %s54_s0 = scalar_lea.vmem %s44_s10, 128  ;;  %p59_p1 = scmp.lt.s32.totalorder %s44_s10, %s44_s10 }
   0x5   :  { %p55_p0 = scmp.ne.s32.totalorder %s44_s10, %s54_s0  ;;  %p60_p2 = scmp.lt.s32.totalorder %s54_s0, %s54_s0 }
   0x6   :  { %v19_v4 = vadd.s32 %v18_v2, %v16_v3 }
   0x7   :  { %p61_p3 = por %p60_p2, %p59_p1 }
   0x8   :  { %v20_v5 = vshrl.u32 %v19_v4, 16 }
   0x9   :  { %p62_p4 = pnand %p61_p3, %p55_p0 }
   0xa   :  { %v21_v6 = vxor.u32 %v20_v5, %v19_v4 }
   0xc   :  { %v22_v7 = vmul.u32 2146121005, %v21_v6 }
   0xe   :  { %v23_v8 = vshrl.u32 %v22_v7, 15 }
  0x10   :  { %v24_v9 = vxor.u32 %v23_v8, %v22_v7 }
  0x12   :  { %v25_v10 = vmul.u32 2221713035, %v24_v9 }
  0x14   :  { %v26_v11 = vshrl.u32 %v25_v10, 16 }
  0x16   :  { %v27_v13 = vxor.u32 %v26_v11, %v25_v10 }
  0x18   :  { %vm28_vm0 = vcmp.lt.u32.totalorder %v27_v13, 1073741824 }
  0x19   :  { %v51_v15 = vsel %vm28_vm0, 1.0, %v79_v14 }
  0x1a   :  { %v34_v16 = vsub.f32 1.0, %v51_v15 }
  0x1c   :  { %v35_v17 = vsel %vm33_vm1, %v51_v15, %v34_v16 }
  0x1d   :  { %36 = vst [vmem:[#allocation3] sm:$0xff] %v35_v17 }
  0x1e   :  { %65 = shalt.err (!%p62_p4)
}
  0x1f   :  { %s66_s13 = scalar_lea.hbm %s106_s1, 128 }
  0x20   :  { %p67_p5 = scmp.ne.s32.totalorder %s106_s1, %s66_s13  ;;  %p70_p6 = scmp.lt.u32.totalorder %s66_s13, %s106_s1 }
  0x22   :  { %p72_p7 = pnand %p70_p6, %p67_p5 }
  0x24   :  { %75 = shalt.err (!%p72_p7)
}
  0x25   :  { %46 = dma.vmem_to_hbm [thread:$0]  %s44_s10, 128, %s106_s1, [#allocation4]  }
  0x26   :  { %76 = dma.done.wait [#allocation4], 128  }
  0x27   :  { %77 = vsyncadd [#allocation4], 4294967168 }
  0x28   :  { %50 = vsyncpa [#allocation4], 1 }

</bundles_post_ra>
